<compile_context>
chip_gen: v7x
topology: tpu7x:2x2x1
jax: 0.10.0
libtpu: 0.0.40
codegen_flags: <defaults>
</compile_context>

<pallas_src>
import jax
import jax.numpy as jnp
from jax.experimental import pallas as pl
from jax.experimental.pallas import tpu as pltpu


def _make_kernel(H, W, C):
    HW = H * W
    C2 = 2 * C

    def kernel(xh_ref, wbig_ref, bias_ref, va_ref,
               xt_ref, at_ref, zt_ref, wt_ref, ut_ref, tant_ref,
               col_ref):
        # ---- masks / iotas hoisted: built exactly once per invocation.
        col = jax.lax.broadcasted_iota(jnp.int32, (1, HW), 1)
        wpos = col % W
        m_left = wpos == 0           # edge for dx < 0
        m_right = wpos == W - 1      # edge for dx > 0
        m_top = col < W              # edge for dy < 0
        m_bot = col >= HW - W        # edge for dy > 0

        def src(a, d):
            # out[..., l] = a[..., (l + d) % HW]   (one XLU lane rotate)
            if d == 0:
                return a
            return pltpu.roll(a, (-d) % HW, a.ndim - 1)

        def shift_w(a, dx):
            # out[.., h, w] = a[.., h, reflect(w + dx)]
            if dx == 0:
                return a
            main = src(a, dx)
            refl = src(a, -dx)       # reflected edge read
            edge = m_left if dx < 0 else m_right
            return jnp.where(edge, refl, main)

        def shift_h(a, dy):
            # out[.., h, w] = a[.., reflect(h + dy), w]
            if dy == 0:
                return a
            main = src(a, dy * W)
            refl = src(a, -dy * W)   # reflected edge read
            edge = m_top if dy < 0 else m_bot
            return jnp.where(edge, refl, main)

        xh = xh_ref[0]               # [2C, HW] f32  (x channels ; Hprev channels)

        # ---- in-VMEM im2col of the stacked (x, Hprev): 9 reflect-shifted taps,
        # cast to bf16 into the [18C, HW] scratch that feeds the MXU.
        xw = {dx: shift_w(xh, dx) for dx in (-1, 0, 1)}   # 4 rolls total
        for dy in (-1, 0, 1):
            for dx in (-1, 0, 1):
                k = (dy + 1) * 3 + (dx + 1)               # tap index = kh*3 + kw
                tap = shift_h(xw[dx], dy)
                col_ref[k * C2:(k + 1) * C2, :] = tap.astype(jnp.bfloat16)

        # ---- fused Wa/Ua conv: ONE block-diagonal MXU matmul (bf16 in, f32 acc).
        wu = jnp.dot(wbig_ref[...], col_ref[...],
                     preferred_element_type=jnp.float32) + bias_ref[...]
        wt = wu[0:C, :]                                   # [C, HW]
        ut = wu[C:C2, :]                                  # [C, HW]
        tant = jnp.tanh(wt + ut)                          # [C, HW] f32 (EUP)

        # ---- Va conv (Cout=1): contract (kw, channel) with one small lane-dense
        # matmul, then fold the three kh taps with [1, HW] lane rolls.
        tw_cat = jnp.concatenate(
            [shift_w(tant, -1), tant, shift_w(tant, 1)], axis=0)    # [3C, HW]
        m3 = jnp.dot(va_ref[...], tw_cat,
                     preferred_element_type=jnp.float32)            # [3, HW]
        zt = shift_h(m3[0:1, :], -1) + m3[1:2, :] + shift_h(m3[2:3, :], 1)

        # ---- spatial softmax over this image's H*W lanes.
        mx = jnp.max(zt, axis=1, keepdims=True)
        e = jnp.exp(zt - mx)
        denom = jnp.sum(e, axis=1, keepdims=True)
        at = e * pl.reciprocal(denom, approx=False)       # exact, sum-to-1 parity

        xt_ref[0] = xh[0:C, :] * at                       # x's center tap IS x
        at_ref[0] = at
        zt_ref[0] = zt
        wt_ref[0] = wt
        ut_ref[0] = ut
        tant_ref[0] = tant

    return kernel


def _fused_wa_ua_weight(wa_w, ua_w):
    """Two [C, C, 3, 3] conv weights -> block-diagonal [2C, 18C] matmul weight.

    Column block k = kh*3 + kw is [[Wa_tap, 0], [0, Ua_tap]] so that
    W_big @ im2col(x ; Hprev) gives (wt_pre ; ut_pre) in one matmul.
    """
    C = wa_w.shape[0]
    z = jnp.zeros((C, C), jnp.float32)
    blocks = []
    for kh in range(3):
        for kw in range(3):
            top = jnp.concatenate([wa_w[:, :, kh, kw], z], axis=1)   # [C, 2C]
            bot = jnp.concatenate([z, ua_w[:, :, kh, kw]], axis=1)   # [C, 2C]
            blocks.append(jnp.concatenate([top, bot], axis=0))       # [2C, 2C]
    return jnp.concatenate(blocks, axis=1)                           # [2C, 18C]


def attentive_forward(x_nchw, params, hprev_nchw=None):
    """Forward of AttentiveModel.  x_nchw: [B, C, H, W] float32 (NCHW)."""
    B, C, H, W = x_nchw.shape
    HW = H * W
    x = x_nchw.astype(jnp.float32)
    h = (jnp.zeros_like(x) if hprev_nchw is None
         else hprev_nchw.astype(jnp.float32))

    # Single small stacked input; the 9x tap expansion happens in VMEM.
    xh = jnp.concatenate([x, h], axis=1).reshape(B, 2 * C, HW)        # [B,2C,HW]

    wbig = _fused_wa_ua_weight(params["wa_w"].astype(jnp.float32),
                               params["ua_w"].astype(jnp.float32))
    wbig = wbig.astype(jnp.bfloat16)                     # bf16 MXU operand
    bias = jnp.concatenate([params["wa_b"], params["ua_b"]])
    bias = bias.reshape(2 * C, 1).astype(jnp.float32)
    # Va: [1, C, 3, 3] -> [3, 3C]   (row = kh, col = kw*C + c); kept f32.
    va_re = jnp.transpose(params["va_w"][0].astype(jnp.float32),
                          (1, 2, 0)).reshape(3, 3 * C)

    kernel = _make_kernel(H, W, C)

    def per_b(rows):   # one image's lane-dense [rows, HW] block
        return pl.BlockSpec((1, rows, HW), lambda b: (b, 0, 0))

    def whole(shape):  # small weight, same block every step
        return pl.BlockSpec(shape, lambda b: (0, 0))

    grid_spec = pltpu.PrefetchScalarGridSpec(
        num_scalar_prefetch=0,
        grid=(B,),
        in_specs=[
            per_b(2 * C),                # xh  (x ; Hprev), f32
            whole((2 * C, 18 * C)),      # fused Wa/Ua weight, bf16
            whole((2 * C, 1)),           # fused bias, f32
            whole((3, 3 * C)),           # Va weight, f32
        ],
        out_specs=[
            per_b(C),    # Xt
            per_b(1),    # At
            per_b(1),    # Zt
            per_b(C),    # wt
            per_b(C),    # ut
            per_b(C),    # tant
        ],
        scratch_shapes=[pltpu.VMEM((18 * C, HW), jnp.bfloat16)],   # im2col taps
    )

    big = jax.ShapeDtypeStruct((B, C, HW), jnp.float32)
    small = jax.ShapeDtypeStruct((B, 1, HW), jnp.float32)

    xt, at, zt, wt, ut, tant = pl.pallas_call(
        kernel,
        out_shape=(big, small, small, big, big, big),
        grid_spec=grid_spec,
        compiler_params=pltpu.CompilerParams(
            dimension_semantics=("parallel",)),   # 2-way split -> both v7x TCs
    )(xh, wbig, bias, va_re)

    shp = (B, C, H, W)
    return (xt.reshape(shp), at.reshape(B, 1, H, W), zt.reshape(B, 1, H, W),
            wt.reshape(shp), ut.reshape(shp), tant.reshape(shp))


def _reference(x, params, hprev):
    """Pure-JAX reference mirroring the PyTorch module (all f32)."""
    def conv(a, w, b):
        ap = jnp.pad(a, ((0, 0), (0, 0), (1, 1), (1, 1)), mode="reflect")
        out = jax.lax.conv_general_dilated(
            ap, w, window_strides=(1, 1), padding="VALID",
            dimension_numbers=("NCHW", "OIHW", "NCHW"))
        if b is not None:
            out = out + b.reshape(1, -1, 1, 1)
        return out

    wt = conv(x, params["wa_w"], params["wa_b"])
    ut = conv(hprev, params["ua_w"], params["ua_b"])
    tant = jnp.tanh(wt + ut)
    zt = conv(tant, params["va_w"], None)
    B, _, H, W = x.shape
    at = jax.nn.softmax(zt.reshape(B, 1, H * W), axis=2).reshape(B, 1, H, W)
    xt = x * at
    return xt, at, zt, wt, ut, tant


def _check_close(name, got, want, rtol, atol):
    err = jnp.abs(got - want)
    ok = bool(jnp.all(err <= rtol * jnp.abs(want) + atol))
    assert ok, f"{name} mismatch, max abs err = {float(jnp.max(err))}"


if __name__ == "__main__":
    # Small shapes consistent with the module: hidden_dim = input channels,
    # dim_feats = spatial size.
    B, hidden_dim, dim_feats = 2, 8, 16

    key = jax.random.PRNGKey(0)
    k_x, k_h, k_waw, k_wab, k_uaw, k_uab, k_vaw = jax.random.split(key, 7)

    x = jax.random.normal(k_x, (B, hidden_dim, dim_feats, dim_feats),
                          dtype=jnp.float32)
    hprev = jax.random.normal(k_h, (B, hidden_dim, dim_feats, dim_feats),
                              dtype=jnp.float32)

    # Parameter shapes mirror the module's __init__.  The module inits
    # Va.weight to 0.0; small random values are used here so the Va path is
    # actually exercised by the correctness check.
    params = {
        "wa_w": 0.1 * jax.random.normal(k_waw, (hidden_dim, hidden_dim, 3, 3),
                                        dtype=jnp.float32),
        "wa_b": 0.1 * jax.random.normal(k_wab, (hidden_dim,), dtype=jnp.float32),
        "ua_w": jax.nn.initializers.orthogonal()(
            k_uaw, (hidden_dim, hidden_dim * 9), jnp.float32
        ).reshape(hidden_dim, hidden_dim, 3, 3),
        "ua_b": 0.1 * jax.random.normal(k_uab, (hidden_dim,), dtype=jnp.float32),
        "va_w": 0.1 * jax.random.normal(k_vaw, (1, hidden_dim, 3, 3),
                                        dtype=jnp.float32),
    }

    fwd = jax.jit(attentive_forward)
    outs = jax.block_until_ready(fwd(x, params, hprev))
    Xt, At, Zt, wt, ut, tant = outs

    assert Xt.shape == (B, hidden_dim, dim_feats, dim_feats)
    assert At.shape == (B, 1, dim_feats, dim_feats)
    assert Zt.shape == (B, 1, dim_feats, dim_feats)
    assert wt.shape == ut.shape == tant.shape == Xt.shape
    assert bool(jnp.allclose(At.sum(axis=(2, 3)), 1.0, atol=1e-5))
    assert bool(jnp.all(jnp.isfinite(Xt)))

    ref = _reference(x, params, hprev)
    names = ("Xt", "At", "Zt", "wt", "ut", "tant")
    # Tolerances account for bf16 MXU operands (f32 accumulation) in Wa/Ua.
    tols = ((0.05, 1e-4), (0.05, 1e-5), (0.05, 2e-2),
            (0.05, 2e-2), (0.05, 2e-2), (0.05, 2e-2))
    for got, want, name, (rtol, atol) in zip(outs, ref, names, tols):
        _check_close(name, got, want, rtol, atol)

    print("KERNEL_OK")
</pallas_src>

<mosaic_0001>
module attributes {stable_mosaic.version = 11 : i64} {
  func.func @kernel(%arg0: i32, %arg1: memref<1x16x256xf32, #tpu.memory_space<vmem>>, %arg2: memref<16x144xbf16, #tpu.memory_space<vmem>>, %arg3: memref<16x1xf32, #tpu.memory_space<vmem>>, %arg4: memref<3x24xf32, #tpu.memory_space<vmem>>, %arg5: memref<1x8x256xf32, #tpu.memory_space<vmem>>, %arg6: memref<1x1x256xf32, #tpu.memory_space<vmem>>, %arg7: memref<1x1x256xf32, #tpu.memory_space<vmem>>, %arg8: memref<1x8x256xf32, #tpu.memory_space<vmem>>, %arg9: memref<1x8x256xf32, #tpu.memory_space<vmem>>, %arg10: memref<1x8x256xf32, #tpu.memory_space<vmem>>, %arg11: memref<144x256xbf16, #tpu.memory_space<vmem>>) attributes {dimension_semantics = [#tpu.dimension_semantics<parallel>], iteration_bounds = array<i64: 2>, scalar_prefetch = 0 : i64, scratch_operands = 1 : i64, tpu.core_type = #tpu.core_type<tc>, window_params = [{transform_indices = @transform_0, window_bounds = array<i64: 1, 16, 256>}, {pipeline_mode = #tpu.pipeline_mode<synchronous>, transform_indices = @transform_1, window_bounds = array<i64: 16, 144>}, {pipeline_mode = #tpu.pipeline_mode<synchronous>, transform_indices = @transform_2, window_bounds = array<i64: 16, 1>}, {pipeline_mode = #tpu.pipeline_mode<synchronous>, transform_indices = @transform_3, window_bounds = array<i64: 3, 24>}, {transform_indices = @transform_4, window_bounds = array<i64: 1, 8, 256>}, {transform_indices = @transform_5, window_bounds = array<i64: 1, 1, 256>}, {transform_indices = @transform_6, window_bounds = array<i64: 1, 1, 256>}, {transform_indices = @transform_7, window_bounds = array<i64: 1, 8, 256>}, {transform_indices = @transform_8, window_bounds = array<i64: 1, 8, 256>}, {transform_indices = @transform_9, window_bounds = array<i64: 1, 8, 256>}]} {
    %0 = tpu.iota {dimensions = array<i32: 1>} : vector<1x256xi32>
    %c16_i32 = arith.constant 16 : i32
    %c0_i32 = arith.constant 0 : i32
    %1 = arith.cmpi eq, %c16_i32, %c0_i32 : i32
    %c1_i32 = arith.constant 1 : i32
    %2 = arith.select %1, %c1_i32, %c16_i32 : i32
    %3 = vector.broadcast %2 : i32 to vector<1x256xi32>
    %4 = arith.remsi %0, %3 : vector<1x256xi32>
    %c0_i32_0 = arith.constant 0 : i32
    %5 = vector.broadcast %c0_i32_0 : i32 to vector<1x256xi32>
    %6 = arith.cmpi ne, %4, %5 : vector<1x256xi32>
    %c0_i32_1 = arith.constant 0 : i32
    %7 = vector.broadcast %c0_i32_1 : i32 to vector<1x256xi32>
    %8 = arith.cmpi slt, %4, %7 : vector<1x256xi32>
    %c0_i32_2 = arith.constant 0 : i32
    %9 = arith.cmpi slt, %2, %c0_i32_2 : i32
    %10 = vector.broadcast %9 : i1 to vector<1x256xi1>
    %11 = vector.broadcast %10 : vector<1x256xi1> to vector<1x256xi1>
    %12 = arith.xori %8, %11 : vector<1x256xi1>
    %13 = arith.andi %12, %6 : vector<1x256xi1>
    %14 = vector.broadcast %2 : i32 to vector<1x256xi32>
    %15 = arith.addi %4, %14 : vector<1x256xi32>
    %16 = arith.select %13, %15, %4 : vector<1x256xi1>, vector<1x256xi32>
    %c0_i32_3 = arith.constant 0 : i32
    %17 = vector.broadcast %c0_i32_3 : i32 to vector<1x256xi32>
    %18 = arith.cmpi eq, %16, %17 : vector<1x256xi32>
    %c15_i32 = arith.constant 15 : i32
    %19 = vector.broadcast %c15_i32 : i32 to vector<1x256xi32>
    %20 = arith.cmpi eq, %16, %19 : vector<1x256xi32>
    %c16_i32_4 = arith.constant 16 : i32
    %21 = vector.broadcast %c16_i32_4 : i32 to vector<1x256xi32>
    %22 = arith.cmpi slt, %0, %21 : vector<1x256xi32>
    %c240_i32 = arith.constant 240 : i32
    %23 = vector.broadcast %c240_i32 : i32 to vector<1x256xi32>
    %24 = arith.cmpi sge, %0, %23 : vector<1x256xi32>
    %c0 = arith.constant 0 : index
    %c0_5 = arith.constant 0 : index
    %c0_6 = arith.constant 0 : index
    %25 = vector.load %arg1[%c0, %c0_5, %c0_6] : memref<1x16x256xf32, #tpu.memory_space<vmem>>, vector<1x16x256xf32>
    %26 = vector.shape_cast %25 : vector<1x16x256xf32> to vector<16x256xf32>
    %c1_i32_7 = arith.constant 1 : i32
    %27 = tpu.dynamic_rotate %26 by %c1_i32_7 dim 1 : vector<16x256xf32>, i32 -> vector<16x256xf32>
    %c255_i32 = arith.constant 255 : i32
    %28 = tpu.dynamic_rotate %26 by %c255_i32 dim 1 : vector<16x256xf32>, i32 -> vector<16x256xf32>
    %29 = vector.shape_cast %18 : vector<1x256xi1> to vector<1x256xi1>
    %30 = vector.broadcast %29 : vector<1x256xi1> to vector<16x256xi1>
    %31 = arith.select %30, %28, %27 : vector<16x256xi1>, vector<16x256xf32>
    %c255_i32_8 = arith.constant 255 : i32
    %32 = tpu.dynamic_rotate %26 by %c255_i32_8 dim 1 : vector<16x256xf32>, i32 -> vector<16x256xf32>
    %c1_i32_9 = arith.constant 1 : i32
    %33 = tpu.dynamic_rotate %26 by %c1_i32_9 dim 1 : vector<16x256xf32>, i32 -> vector<16x256xf32>
    %34 = vector.shape_cast %20 : vector<1x256xi1> to vector<1x256xi1>
    %35 = vector.broadcast %34 : vector<1x256xi1> to vector<16x256xi1>
    %36 = arith.select %35, %33, %32 : vector<16x256xi1>, vector<16x256xf32>
    %c16_i32_10 = arith.constant 16 : i32
    %37 = tpu.dynamic_rotate %31 by %c16_i32_10 dim 1 : vector<16x256xf32>, i32 -> vector<16x256xf32>
    %c240_i32_11 = arith.constant 240 : i32
    %38 = tpu.dynamic_rotate %31 by %c240_i32_11 dim 1 : vector<16x256xf32>, i32 -> vector<16x256xf32>
    %39 = vector.shape_cast %22 : vector<1x256xi1> to vector<1x256xi1>
    %40 = vector.broadcast %39 : vector<1x256xi1> to vector<16x256xi1>
    %41 = arith.select %40, %38, %37 : vector<16x256xi1>, vector<16x256xf32>
    %42 = arith.truncf %41 : vector<16x256xf32> to vector<16x256xbf16>
    %c0_12 = arith.constant 0 : index
    %c0_13 = arith.constant 0 : index
    %43 = vector.load %arg11[%c0_12, %c0_13] : memref<144x256xbf16, #tpu.memory_space<vmem>>, vector<16x256xbf16>
    tpu.vector_store %arg11[%c0_12, %c0_13], %42 {strides = array<i32>} : memref<144x256xbf16, #tpu.memory_space<vmem>>, vector<16x256xbf16>,
    %c16_i32_14 = arith.constant 16 : i32
    %44 = tpu.dynamic_rotate %26 by %c16_i32_14 dim 1 : vector<16x256xf32>, i32 -> vector<16x256xf32>
    %c240_i32_15 = arith.constant 240 : i32
    %45 = tpu.dynamic_rotate %26 by %c240_i32_15 dim 1 : vector<16x256xf32>, i32 -> vector<16x256xf32>
    %46 = vector.shape_cast %22 : vector<1x256xi1> to vector<1x256xi1>
    %47 = vector.broadcast %46 : vector<1x256xi1> to vector<16x256xi1>
    %48 = arith.select %47, %45, %44 : vector<16x256xi1>, vector<16x256xf32>
    %49 = arith.truncf %48 : vector<16x256xf32> to vector<16x256xbf16>
    %c16 = arith.constant 16 : index
    %c0_16 = arith.constant 0 : index
    %50 = vector.load %arg11[%c16, %c0_16] : memref<144x256xbf16, #tpu.memory_space<vmem>>, vector<16x256xbf16>
    tpu.vector_store %arg11[%c16, %c0_16], %49 {strides = array<i32>} : memref<144x256xbf16, #tpu.memory_space<vmem>>, vector<16x256xbf16>,
    %c16_i32_17 = arith.constant 16 : i32
    %51 = tpu.dynamic_rotate %36 by %c16_i32_17 dim 1 : vector<16x256xf32>, i32 -> vector<16x256xf32>
    %c240_i32_18 = arith.constant 240 : i32
    %52 = tpu.dynamic_rotate %36 by %c240_i32_18 dim 1 : vector<16x256xf32>, i32 -> vector<16x256xf32>
    %53 = vector.shape_cast %22 : vector<1x256xi1> to vector<1x256xi1>
    %54 = vector.broadcast %53 : vector<1x256xi1> to vector<16x256xi1>
    %55 = arith.select %54, %52, %51 : vector<16x256xi1>, vector<16x256xf32>
    %56 = arith.truncf %55 : vector<16x256xf32> to vector<16x256xbf16>
    %c32 = arith.constant 32 : index
    %c0_19 = arith.constant 0 : index
    %57 = vector.load %arg11[%c32, %c0_19] : memref<144x256xbf16, #tpu.memory_space<vmem>>, vector<16x256xbf16>
    tpu.vector_store %arg11[%c32, %c0_19], %56 {strides = array<i32>} : memref<144x256xbf16, #tpu.memory_space<vmem>>, vector<16x256xbf16>,
    %58 = arith.truncf %31 : vector<16x256xf32> to vector<16x256xbf16>
    %c48 = arith.constant 48 : index
    %c0_20 = arith.constant 0 : index
    %59 = vector.load %arg11[%c48, %c0_20] : memref<144x256xbf16, #tpu.memory_space<vmem>>, vector<16x256xbf16>
    tpu.vector_store %arg11[%c48, %c0_20], %58 {strides = array<i32>} : memref<144x256xbf16, #tpu.memory_space<vmem>>, vector<16x256xbf16>,
    %60 = arith.truncf %26 : vector<16x256xf32> to vector<16x256xbf16>
    %c64 = arith.constant 64 : index
    %c0_21 = arith.constant 0 : index
    %61 = vector.load %arg11[%c64, %c0_21] : memref<144x256xbf16, #tpu.memory_space<vmem>>, vector<16x256xbf16>
    tpu.vector_store %arg11[%c64, %c0_21], %60 {strides = array<i32>} : memref<144x256xbf16, #tpu.memory_space<vmem>>, vector<16x256xbf16>,
    %62 = arith.truncf %36 : vector<16x256xf32> to vector<16x256xbf16>
    %c80 = arith.constant 80 : index
    %c0_22 = arith.constant 0 : index
    %63 = vector.load %arg11[%c80, %c0_22] : memref<144x256xbf16, #tpu.memory_space<vmem>>, vector<16x256xbf16>
    tpu.vector_store %arg11[%c80, %c0_22], %62 {strides = array<i32>} : memref<144x256xbf16, #tpu.memory_space<vmem>>, vector<16x256xbf16>,
    %c240_i32_23 = arith.constant 240 : i32
    %64 = tpu.dynamic_rotate %31 by %c240_i32_23 dim 1 : vector<16x256xf32>, i32 -> vector<16x256xf32>
    %c16_i32_24 = arith.constant 16 : i32
    %65 = tpu.dynamic_rotate %31 by %c16_i32_24 dim 1 : vector<16x256xf32>, i32 -> vector<16x256xf32>
    %66 = vector.shape_cast %24 : vector<1x256xi1> to vector<1x256xi1>
    %67 = vector.broadcast %66 : vector<1x256xi1> to vector<16x256xi1>
    %68 = arith.select %67, %65, %64 : vector<16x256xi1>, vector<16x256xf32>
    %69 = arith.truncf %68 : vector<16x256xf32> to vector<16x256xbf16>
    %c96 = arith.constant 96 : index
    %c0_25 = arith.constant 0 : index
    %70 = vector.load %arg11[%c96, %c0_25] : memref<144x256xbf16, #tpu.memory_space<vmem>>, vector<16x256xbf16>
    tpu.vector_store %arg11[%c96, %c0_25], %69 {strides = array<i32>} : memref<144x256xbf16, #tpu.memory_space<vmem>>, vector<16x256xbf16>,
    %c240_i32_26 = arith.constant 240 : i32
    %71 = tpu.dynamic_rotate %26 by %c240_i32_26 dim 1 : vector<16x256xf32>, i32 -> vector<16x256xf32>
    %c16_i32_27 = arith.constant 16 : i32
    %72 = tpu.dynamic_rotate %26 by %c16_i32_27 dim 1 : vector<16x256xf32>, i32 -> vector<16x256xf32>
    %73 = vector.shape_cast %24 : vector<1x256xi1> to vector<1x256xi1>
    %74 = vector.broadcast %73 : vector<1x256xi1> to vector<16x256xi1>
    %75 = arith.select %74, %72, %71 : vector<16x256xi1>, vector<16x256xf32>
    %76 = arith.truncf %75 : vector<16x256xf32> to vector<16x256xbf16>
    %c112 = arith.constant 112 : index
    %c0_28 = arith.constant 0 : index
    %77 = vector.load %arg11[%c112, %c0_28] : memref<144x256xbf16, #tpu.memory_space<vmem>>, vector<16x256xbf16>
    tpu.vector_store %arg11[%c112, %c0_28], %76 {strides = array<i32>} : memref<144x256xbf16, #tpu.memory_space<vmem>>, vector<16x256xbf16>,
    %c240_i32_29 = arith.constant 240 : i32
    %78 = tpu.dynamic_rotate %36 by %c240_i32_29 dim 1 : vector<16x256xf32>, i32 -> vector<16x256xf32>
    %c16_i32_30 = arith.constant 16 : i32
    %79 = tpu.dynamic_rotate %36 by %c16_i32_30 dim 1 : vector<16x256xf32>, i32 -> vector<16x256xf32>
    %80 = vector.shape_cast %24 : vector<1x256xi1> to vector<1x256xi1>
    %81 = vector.broadcast %80 : vector<1x256xi1> to vector<16x256xi1>
    %82 = arith.select %81, %79, %78 : vector<16x256xi1>, vector<16x256xf32>
    %83 = arith.truncf %82 : vector<16x256xf32> to vector<16x256xbf16>
    %c128 = arith.constant 128 : index
    %c0_31 = arith.constant 0 : index
    %84 = vector.load %arg11[%c128, %c0_31] : memref<144x256xbf16, #tpu.memory_space<vmem>>, vector<16x256xbf16>
    tpu.vector_store %arg11[%c128, %c0_31], %83 {strides = array<i32>} : memref<144x256xbf16, #tpu.memory_space<vmem>>, vector<16x256xbf16>,
    %c0_32 = arith.constant 0 : index
    %c0_33 = arith.constant 0 : index
    %85 = vector.load %arg2[%c0_32, %c0_33] : memref<16x144xbf16, #tpu.memory_space<vmem>>, vector<16x144xbf16>
    %c0_34 = arith.constant 0 : index
    %c0_35 = arith.constant 0 : index
    %86 = vector.load %arg11[%c0_34, %c0_35] : memref<144x256xbf16, #tpu.memory_space<vmem>>, vector<144x256xbf16>
    %cst = arith.constant dense<0.000000e+00> : vector<16x256xf32>
    %87 = tpu.matmul %85, %86, %cst {dimension_numbers = #tpu.dot_dimension_numbers<[1], [0], [0], [1], [0, 0, 1, 1], [], []>} : vector<16x144xbf16>, vector<144x256xbf16>, vector<16x256xf32> -> vector<16x256xf32>
    %c0_36 = arith.constant 0 : index
    %c0_37 = arith.constant 0 : index
    %88 = vector.load %arg3[%c0_36, %c0_37] : memref<16x1xf32, #tpu.memory_space<vmem>>, vector<16x1xf32>
    %89 = vector.broadcast %88 : vector<16x1xf32> to vector<16x256xf32>
    %90 = arith.addf %87, %89 : vector<16x256xf32>
    %91 = vector.extract_strided_slice %90 {offsets = [0, 0], sizes = [8, 256], strides = [1, 1]} : vector<16x256xf32> to vector<8x256xf32>
    %92 = vector.extract_strided_slice %90 {offsets = [8, 0], sizes = [8, 256], strides = [1, 1]} : vector<16x256xf32> to vector<8x256xf32>
    %93 = arith.addf %91, %92 : vector<8x256xf32>
    %94 = math.tanh %93 : vector<8x256xf32>
    %c1_i32_38 = arith.constant 1 : i32
    %95 = tpu.dynamic_rotate %94 by %c1_i32_38 dim 1 : vector<8x256xf32>, i32 -> vector<8x256xf32>
    %c255_i32_39 = arith.constant 255 : i32
    %96 = tpu.dynamic_rotate %94 by %c255_i32_39 dim 1 : vector<8x256xf32>, i32 -> vector<8x256xf32>
    %97 = vector.shape_cast %18 : vector<1x256xi1> to vector<1x256xi1>
    %98 = vector.broadcast %97 : vector<1x256xi1> to vector<8x256xi1>
    %99 = arith.select %98, %96, %95 : vector<8x256xi1>, vector<8x256xf32>
    %c255_i32_40 = arith.constant 255 : i32
    %100 = tpu.dynamic_rotate %94 by %c255_i32_40 dim 1 : vector<8x256xf32>, i32 -> vector<8x256xf32>
    %c1_i32_41 = arith.constant 1 : i32
    %101 = tpu.dynamic_rotate %94 by %c1_i32_41 dim 1 : vector<8x256xf32>, i32 -> vector<8x256xf32>
    %102 = vector.shape_cast %20 : vector<1x256xi1> to vector<1x256xi1>
    %103 = vector.broadcast %102 : vector<1x256xi1> to vector<8x256xi1>
    %104 = arith.select %103, %101, %100 : vector<8x256xi1>, vector<8x256xf32>
    %105 = tpu.concatenate %99, %94, %104 in 0 : vector<8x256xf32>, vector<8x256xf32>, vector<8x256xf32> -> vector<24x256xf32>
    %c0_42 = arith.constant 0 : index
    %c0_43 = arith.constant 0 : index
    %106 = vector.load %arg4[%c0_42, %c0_43] : memref<3x24xf32, #tpu.memory_space<vmem>>, vector<3x24xf32>
    %cst_44 = arith.constant dense<0.000000e+00> : vector<3x256xf32>
    %107 = tpu.matmul %106, %105, %cst_44 {dimension_numbers = #tpu.dot_dimension_numbers<[1], [0], [0], [1], [0, 0, 1, 1], [], []>} : vector<3x24xf32>, vector<24x256xf32>, vector<3x256xf32> -> vector<3x256xf32>
    %108 = vector.extract_strided_slice %107 {offsets = [0, 0], sizes = [1, 256], strides = [1, 1]} : vector<3x256xf32> to vector<1x256xf32>
    %c16_i32_45 = arith.constant 16 : i32
    %109 = tpu.dynamic_rotate %108 by %c16_i32_45 dim 1 : vector<1x256xf32>, i32 -> vector<1x256xf32>
    %c240_i32_46 = arith.constant 240 : i32
    %110 = tpu.dynamic_rotate %108 by %c240_i32_46 dim 1 : vector<1x256xf32>, i32 -> vector<1x256xf32>
    %111 = arith.select %22, %110, %109 : vector<1x256xi1>, vector<1x256xf32>
    %112 = vector.extract_strided_slice %107 {offsets = [1, 0], sizes = [1, 256], strides = [1, 1]} : vector<3x256xf32> to vector<1x256xf32>
    %113 = arith.addf %111, %112 : vector<1x256xf32>
    %114 = vector.extract_strided_slice %107 {offsets = [2, 0], sizes = [1, 256], strides = [1, 1]} : vector<3x256xf32> to vector<1x256xf32>
    %c240_i32_47 = arith.constant 240 : i32
    %115 = tpu.dynamic_rotate %114 by %c240_i32_47 dim 1 : vector<1x256xf32>, i32 -> vector<1x256xf32>
    %c16_i32_48 = arith.constant 16 : i32
    %116 = tpu.dynamic_rotate %114 by %c16_i32_48 dim 1 : vector<1x256xf32>, i32 -> vector<1x256xf32>
    %117 = arith.select %24, %116, %115 : vector<1x256xi1>, vector<1x256xf32>
    %118 = arith.addf %113, %117 : vector<1x256xf32>
    %cst_49 = arith.constant dense<0xFF800000> : vector<1xf32>
    %119 = vector.multi_reduction <maximumf>, %118, %cst_49 [1] : vector<1x256xf32> to vector<1xf32>
    %120 = vector.shape_cast %119 : vector<1xf32> to vector<1x1xf32>
    %121 = vector.broadcast %120 : vector<1x1xf32> to vector<1x256xf32>
    %122 = arith.subf %118, %121 : vector<1x256xf32>
    %123 = math.exp %122 : vector<1x256xf32>
    %cst_50 = arith.constant dense<0.000000e+00> : vector<1xf32>
    %124 = vector.multi_reduction <add>, %123, %cst_50 [1] : vector<1x256xf32> to vector<1xf32>
    %125 = vector.shape_cast %124 : vector<1xf32> to vector<1x1xf32>
    %126 = tpu.reciprocal %125 : vector<1x1xf32> -> vector<1x1xf32>
    %127 = vector.broadcast %126 : vector<1x1xf32> to vector<1x256xf32>
    %128 = arith.mulf %123, %127 : vector<1x256xf32>
    %129 = vector.extract_strided_slice %26 {offsets = [0, 0], sizes = [8, 256], strides = [1, 1]} : vector<16x256xf32> to vector<8x256xf32>
    %130 = vector.broadcast %128 : vector<1x256xf32> to vector<8x256xf32>
    %131 = arith.mulf %129, %130 : vector<8x256xf32>
    %c0_51 = arith.constant 0 : index
    %c0_52 = arith.constant 0 : index
    %c0_53 = arith.constant 0 : index
    %132 = vector.load %arg5[%c0_51, %c0_52, %c0_53] : memref<1x8x256xf32, #tpu.memory_space<vmem>>, vector<1x8x256xf32>
    %133 = vector.shape_cast %132 : vector<1x8x256xf32> to vector<8x256xf32>
    %134 = vector.shape_cast %131 : vector<8x256xf32> to vector<1x8x256xf32>
    tpu.vector_store %arg5[%c0_51, %c0_52, %c0_53], %134 {strides = array<i32>} : memref<1x8x256xf32, #tpu.memory_space<vmem>>, vector<1x8x256xf32>,
    %c0_54 = arith.constant 0 : index
    %c0_55 = arith.constant 0 : index
    %c0_56 = arith.constant 0 : index
    %135 = vector.load %arg6[%c0_54, %c0_55, %c0_56] : memref<1x1x256xf32, #tpu.memory_space<vmem>>, vector<1x1x256xf32>
    %136 = vector.shape_cast %135 : vector<1x1x256xf32> to vector<1x256xf32>
    %137 = vector.shape_cast %128 : vector<1x256xf32> to vector<1x1x256xf32>
    tpu.vector_store %arg6[%c0_54, %c0_55, %c0_56], %137 {strides = array<i32>} : memref<1x1x256xf32, #tpu.memory_space<vmem>>, vector<1x1x256xf32>,
    %c0_57 = arith.constant 0 : index
    %c0_58 = arith.constant 0 : index
    %c0_59 = arith.constant 0 : index
    %138 = vector.load %arg7[%c0_57, %c0_58, %c0_59] : memref<1x1x256xf32, #tpu.memory_space<vmem>>, vector<1x1x256xf32>
    %139 = vector.shape_cast %138 : vector<1x1x256xf32> to vector<1x256xf32>
    %140 = vector.shape_cast %118 : vector<1x256xf32> to vector<1x1x256xf32>
    tpu.vector_store %arg7[%c0_57, %c0_58, %c0_59], %140 {strides = array<i32>} : memref<1x1x256xf32, #tpu.memory_space<vmem>>, vector<1x1x256xf32>,
    %c0_60 = arith.constant 0 : index
    %c0_61 = arith.constant 0 : index
    %c0_62 = arith.constant 0 : index
    %141 = vector.load %arg8[%c0_60, %c0_61, %c0_62] : memref<1x8x256xf32, #tpu.memory_space<vmem>>, vector<1x8x256xf32>
    %142 = vector.shape_cast %141 : vector<1x8x256xf32> to vector<8x256xf32>
    %143 = vector.shape_cast %91 : vector<8x256xf32> to vector<1x8x256xf32>
    tpu.vector_store %arg8[%c0_60, %c0_61, %c0_62], %143 {strides = array<i32>} : memref<1x8x256xf32, #tpu.memory_space<vmem>>, vector<1x8x256xf32>,
    %c0_63 = arith.constant 0 : index
    %c0_64 = arith.constant 0 : index
    %c0_65 = arith.constant 0 : index
    %144 = vector.load %arg9[%c0_63, %c0_64, %c0_65] : memref<1x8x256xf32, #tpu.memory_space<vmem>>, vector<1x8x256xf32>
    %145 = vector.shape_cast %144 : vector<1x8x256xf32> to vector<8x256xf32>
    %146 = vector.shape_cast %92 : vector<8x256xf32> to vector<1x8x256xf32>
    tpu.vector_store %arg9[%c0_63, %c0_64, %c0_65], %146 {strides = array<i32>} : memref<1x8x256xf32, #tpu.memory_space<vmem>>, vector<1x8x256xf32>,
    %c0_66 = arith.constant 0 : index
    %c0_67 = arith.constant 0 : index
    %c0_68 = arith.constant 0 : index
    %147 = vector.load %arg10[%c0_66, %c0_67, %c0_68] : memref<1x8x256xf32, #tpu.memory_space<vmem>>, vector<1x8x256xf32>
    %148 = vector.shape_cast %147 : vector<1x8x256xf32> to vector<8x256xf32>
    %149 = vector.shape_cast %94 : vector<8x256xf32> to vector<1x8x256xf32>
    tpu.vector_store %arg10[%c0_66, %c0_67, %c0_68], %149 {strides = array<i32>} : memref<1x8x256xf32, #tpu.memory_space<vmem>>, vector<1x8x256xf32>,
    return
  }
  func.func @transform_0(%arg0: i32) -> (i32, i32, i32) {
    %c0_i32 = arith.constant 0 : i32
    %c0_i32_0 = arith.constant 0 : i32
    %c0_i32_1 = arith.constant 0 : i32
    return %arg0, %c0_i32, %c0_i32_0 : i32, i32, i32
  }
  func.func @transform_1(%arg0: i32) -> (i32, i32) {
    %c0_i32 = arith.constant 0 : i32
    %c0_i32_0 = arith.constant 0 : i32
    %c0_i32_1 = arith.constant 0 : i32
    return %c0_i32, %c0_i32_0 : i32, i32
  }
  func.func @transform_2(%arg0: i32) -> (i32, i32) {
    %c0_i32 = arith.constant 0 : i32
    %c0_i32_0 = arith.constant 0 : i32
    %c0_i32_1 = arith.constant 0 : i32
    return %c0_i32, %c0_i32_0 : i32, i32
  }
  func.func @transform_3(%arg0: i32) -> (i32, i32) {
    %c0_i32 = arith.constant 0 : i32
    %c0_i32_0 = arith.constant 0 : i32
    %c0_i32_1 = arith.constant 0 : i32
    return %c0_i32, %c0_i32_0 : i32, i32
  }
  func.func @transform_4(%arg0: i32) -> (i32, i32, i32) {
    %c0_i32 = arith.constant 0 : i32
    %c0_i32_0 = arith.constant 0 : i32
    %c0_i32_1 = arith.constant 0 : i32
    return %arg0, %c0_i32, %c0_i32_0 : i32, i32, i32
  }
  func.func @transform_5(%arg0: i32) -> (i32, i32, i32) {
    %c0_i32 = arith.constant 0 : i32
    %c0_i32_0 = arith.constant 0 : i32
    %c0_i32_1 = arith.constant 0 : i32
    return %arg0, %c0_i32, %c0_i32_0 : i32, i32, i32
  }
  func.func @transform_6(%arg0: i32) -> (i32, i32, i32) {
    %c0_i32 = arith.constant 0 : i32
    %c0_i32_0 = arith.constant 0 : i32
    %c0_i32_1 = arith.constant 0 : i32
    return %arg0, %c0_i32, %c0_i32_0 : i32, i32, i32
  }
  func.func @transform_7(%arg0: i32) -> (i32, i32, i32) {
    %c0_i32 = arith.constant 0 : i32
    %c0_i32_0 = arith.constant 0 : i32
    %c0_i32_1 = arith.constant 0 : i32
    return %arg0, %c0_i32, %c0_i32_0 : i32, i32, i32
  }
  func.func @transform_8(%arg0: i32) -> (i32, i32, i32) {
    %c0_i32 = arith.constant 0 : i32
    %c0_i32_0 = arith.constant 0 : i32
    %c0_i32_1 = arith.constant 0 : i32
    return %arg0, %c0_i32, %c0_i32_0 : i32, i32, i32
  }
  func.func @transform_9(%arg0: i32) -> (i32, i32, i32) {
    %c0_i32 = arith.constant 0 : i32
    %c0_i32_0 = arith.constant 0 : i32
    %c0_i32_1 = arith.constant 0 : i32
    return %arg0, %c0_i32, %c0_i32_0 : i32, i32, i32
  }
}

</mosaic_0001>

<bundles_post_ra>
// kernel: attentive_forward.1
= control target key start
LH: loop header
LB: loop body
LE: loop exit
PB: predicated region body
PF: predicated region fallthrough
CT: control target
= control target key end

     0   :  { %s1342_s30 = smov 0   ;;  %s1713_s0 = inlined_call_operand.vmem [shape: f32[2,16,256], index: 0, kind: input, shape index: {}]   ;;  %s1714_s1 = inlined_call_operand.vmem [shape: bf16[16,144], index: 1, kind: input, shape index: {}]   ;;  %s1715_s2 = inlined_call_operand.vmem [shape: f32[16,1], index: 2, kind: input, shape index: {}]   ;;  %s1716_s3 = inlined_call_operand.vmem [shape: f32[3,24], index: 3, kind: input, shape index: {}]   ;;  %s1717_s4 = inlined_call_operand.vmem [shape: f32[2,8,256], index: 4, kind: output, shape index: {0}]   ;;  %s1718_s5 = inlined_call_operand.vmem [shape: f32[2,1,256], index: 5, kind: output, shape index: {1}]   ;;  %s1719_s6 = inlined_call_operand.vmem [shape: f32[2,1,256], index: 6, kind: output, shape index: {2}]   ;;  %s1720_s7 = inlined_call_operand.vmem [shape: f32[2,8,256], index: 7, kind: output, shape index: {3}]   ;;  %s1721_s8 = inlined_call_operand.vmem [shape: f32[2,8,256], index: 8, kind: output, shape index: {4}]   ;;  %s1722_s9 = inlined_call_operand.vmem [shape: f32[2,8,256], index: 9, kind: output, shape index: {5}]  }
   0x1 LB: > { %s1135_s10 = sadd.s32 4294967295, %s1283_s30   ;;  %p1139_p0 = scmp.ge.s32.totalorder %s1283_s30, 1  ;;  %s1283_s30 = sphi %s1342_s30, %s20_s30  }
   0x2   : > { %p298_p1 = scmp.lt.s32.totalorder %s1283_s30, 3 }
   0x4   : > { %p299_p2 = pnand %p1139_p0, %p298_p1 }
   0x5   : > { %p357_p3 = scmp.lt.s32.totalorder (!%p299_p2), %s1135_s10, 1  ;;  %s1285_s15 = smov (!%p299_p2), 127   ;;  %v391_v6 = vlaneseq (!%p299_p2)  ;;  %v1266_v51 = vld [vmem:[%s1714_s1 + $0x4] ss:$8 sps:$4 sm:$0xff] (!%p299_p2)   ;;  %vm654_vm6 = vcmask (!%p299_p2), 130048   ;;  %v1289_v54 = vmov (!%p299_p2), 0  }
   0x6   : > { %302 = sbr.rel (%p299_p2) target bundleno = 1335 (0x537), region = 36  ;;  %s1286_s16 = smov (!%p299_p2), 1   ;;  %1154 = vmatprep.mubr.msk.bf16.mxu0 (!%p299_p2), %vm654_vm6, %v1266_v51  ;;  %v633_v52 = vld [vmem:[%s1715_s2] sm:$0xff] (!%p299_p2)  ;;  %v634_v53 = vld [vmem:[%s1715_s2 + $0x8] sm:$0xff] (!%p299_p2)  ;;  %1262 = vset.pattern.permute.xlu0 (!%p299_p2), %v1289_v54  ;;  %vm722_vm10 = vcmask (!%p299_p2), 195584   ;;  %vm839_vm11 = vcmask (!%p299_p2), 1040384  }
   0x7   : > { %s1287_s17 = smov (!%p299_p2), 16   ;;  %s1288_s18 = smov (!%p299_p2), 112   ;;  %v1377_v7 = vand.u32 (!%p299_p2), 127, %v391_v6  ;;  %1263 = vset.pattern.permute.xlu1 (!%p299_p2), %v1289_v54  ;;  %vm1689_vm12 = vcmp.lt.s32.totalorder (!%p299_p2), %v391_v6, 256 }
   0x9   : > { %v1380_v8 = vadd.s32 (!%p299_p2), 128, %v1377_v7  ;;  %v398_v11 = vand.u32 (!%p299_p2), 15, %v1377_v7  ;;  %vm451_vm0 = vcmp.lt.s32.totalorder (!%p299_p2), %v1377_v7, 127  ;;  %vm438_vm1 = vcmp.lt.s32.totalorder (!%p299_p2), %v1377_v7, 1 }
   0xa   : > { %vm422_vm7 = vcmp.lt.s32.totalorder (!%p299_p2), %v1377_v7, 16  ;;  %vm492_vm8 = vcmp.lt.s32.totalorder (!%p299_p2), %v1377_v7, 112 }
   0xb   : > { %v405_v12 = vand.u32 (!%p299_p2), 15, %v1380_v8  ;;  %vm1386_vm2 = vcmp.eq.s32.totalorder (!%p299_p2), %v398_v11, 0  ;;  %vm1430_vm4 = vcmp.eq.s32.totalorder (!%p299_p2), %v398_v11, 15  ;;  %vm425_vm9 = vcmp.ge.s32.totalorder (!%p299_p2), %v1380_v8, 240 }
   0xd   : > { %s1734_s10 = smov (!%p357_p3, %s1135_s10), 1  ;;  %vm1390_vm3 = vcmp.eq.s32.totalorder %v405_v12, 0  ;;  %vm1436_vm5 = vcmp.eq.s32.totalorder %v405_v12, 15 }
   0xe   : > { %s1158_s11 = sshll.u32 %s1734_s10, 5  ;;  %s1618_s27 = sshll.u32 %s1734_s10, 4 }
   0xf   : > { %s361_s14 = scalar_lea.vmem %s1713_s0, %s1158_s11  ;;  %s379_s11 = scalar_lea.vmem %s1720_s7, %s1618_s27 }
  0x10   : > { %v1356_v0 = vld [vmem:[%s361_s14] sm:$0xff]  ;;  %v1358_v1 = vld [vmem:[%s361_s14 + $0x10] sm:$0xff]  ;;  %v1360_v2 = vld [vmem:[%s361_s14 + $0x8] sm:$0xff]  ;;  %s389_s21 = scalar_lea.vmem %s1722_s9, %s1618_s27  ;;  %s366_s26 = scalar_lea.vmem %s1717_s4, %s1618_s27 }
  0x11   : > { %v1192_v3 = vpack.i.bf16 %v1358_v1, %v1356_v0  ;;  %v1364_v4 = vld [vmem:[%s361_s14 + $0x18] sm:$0xff]  ;;  %s384_s14 = scalar_lea.vmem %s1721_s8, %s1618_s27 }
  0x12   : > { %v1197_v5 = vpack.i.bf16 %v1364_v4, %v1360_v2 }
  0x13   : > { %1193 = vrot.lane.b32.xlu1 %v1192_v3, %s1285_s15  ;;  %1183 = vrot.lane.b32.xlu0 %v1192_v3, %s1286_s16 }
  0x17   : > { %1198 = vrot.lane.b32.xlu1 %v1197_v5, %s1285_s15  ;;  %1188 = vrot.lane.b32.xlu0 %v1197_v5, %s1286_s16 }
  0x1b   : > { %1208 = vrot.lane.b32.xlu1 %v1197_v5, %s1287_s17  ;;  %1203 = vrot.lane.b32.xlu0 %v1192_v3, %s1287_s17 }
  0x1f   : > { %1218 = vrot.lane.b32.xlu1 %v1197_v5, %s1288_s18  ;;  %1213 = vrot.lane.b32.xlu0 %v1192_v3, %s1288_s18 }
  0x85   : > { %v1194_v9 = vpop.permute.xlu1 %1193  ;;  %v1184_v10 = vpop.permute.xlu0 %1183 }
  0x86   : > { %v1196_v13 = vunpack.i.h.bf16 %v1194_v9  ;;  %v1195_v14 = vunpack.i.l.bf16 %v1194_v9  ;;  %v1186_v21 = vunpack.i.h.bf16 %v1184_v10  ;;  %v1185_v22 = vunpack.i.l.bf16 %v1184_v10 }
  0x89   : > { %v1199_v15 = vpop.permute.xlu1 %1198  ;;  %v1189_v16 = vpop.permute.xlu0 %1188 }
  0x8a   : > { %v1201_v17 = vunpack.i.h.bf16 %v1199_v15  ;;  %v1200_v18 = vunpack.i.l.bf16 %v1199_v15  ;;  %v1191_v19 = vunpack.i.h.bf16 %v1189_v16  ;;  %v1190_v20 = vunpack.i.l.bf16 %v1189_v16 }
  0x8c   : > { %v452_v25 = vsel %vm451_vm0, %v1195_v14, %v1200_v18  ;;  %v453_v26 = vsel %vm451_vm0, %v1196_v13, %v1201_v17  ;;  %v454_v27 = vsel %vm451_vm0, %v1200_v18, %v1195_v14  ;;  %v455_v28 = vsel %vm451_vm0, %v1201_v17, %v1196_v13 }
  0x8d   : > { %v439_v29 = vsel %vm438_vm1, %v1185_v22, %v1190_v20  ;;  %v440_v30 = vsel %vm438_vm1, %v1186_v21, %v1191_v19  ;;  %v441_v31 = vsel %vm438_vm1, %v1190_v20, %v1185_v22  ;;  %v442_v32 = vsel %vm438_vm1, %v1191_v19, %v1186_v21  ;;  %v1209_v55 = vpop.permute.xlu1 %1208  ;;  %v1204_v56 = vpop.permute.xlu0 %1203 }
  0x8e   : > { %v1412_v33 = vsel %vm1386_vm2, %v452_v25, %v441_v31  ;;  %v1416_v34 = vsel %vm1386_vm2, %v453_v26, %v442_v32  ;;  %v1420_v35 = vsel %vm1390_vm3, %v454_v27, %v439_v29  ;;  %v1424_v36 = vsel %vm1390_vm3, %v455_v28, %v440_v30 }
  0x8f   : > { %v1222_v37 = vpack.i.bf16 %v1416_v34, %v1412_v33  ;;  %v1227_v38 = vpack.i.bf16 %v1424_v36, %v1420_v35  ;;  %v1442_v41 = vsel %vm1430_vm4, %v441_v31, %v452_v25  ;;  %v1446_v42 = vsel %vm1430_vm4, %v442_v32, %v453_v26 }
  0x90   : > { %v1450_v43 = vsel %vm1436_vm5, %v439_v29, %v454_v27  ;;  %v1454_v44 = vsel %vm1436_vm5, %v440_v30, %v455_v28  ;;  %v1242_v45 = vpack.i.bf16 %v1446_v42, %v1442_v41  ;;  %v574_v47 = vpack.c.bf16 %v1424_v36, %v1420_v35 }
  0x91   : > { %1223 = vrot.lane.b32.xlu0 %v1222_v37, %s1287_s17  ;;  %1228 = vrot.lane.b32.xlu1 %v1227_v38, %s1287_s17  ;;  %v1247_v46 = vpack.i.bf16 %v1454_v44, %v1450_v43  ;;  %v573_v48 = vpack.c.bf16 %v1416_v34, %v1412_v33  ;;  %v582_v49 = vpack.c.bf16 %v1454_v44, %v1450_v43  ;;  %v1483_v57 = vpop.permute.xlu1 %1218  ;;  %v1485_v58 = vpop.permute.xlu0 %1213  ;;  %v1211_v5 = vunpack.i.h.bf16 %v1209_v55 }
  0x92   : > { %v581_v50 = vpack.c.bf16 %v1446_v42, %v1442_v41  ;;  %v1210_v9 = vunpack.i.l.bf16 %v1209_v55  ;;  %v1206_v10 = vunpack.i.h.bf16 %v1204_v56  ;;  %v1205_v11 = vunpack.i.l.bf16 %v1204_v56 }
  0x93   : > { %v1221_v12 = vunpack.i.h.bf16 %v1483_v57  ;;  %v1220_v15 = vunpack.i.l.bf16 %v1483_v57  ;;  %v1216_v16 = vunpack.i.h.bf16 %v1485_v58  ;;  %v1215_v17 = vunpack.i.l.bf16 %v1485_v58 }
  0x94   : > { %v520_v27 = vsel %vm422_vm7, %v1211_v5, %v1206_v10  ;;  %v519_v28 = vsel %vm422_vm7, %v1210_v9, %v1205_v11  ;;  %v517_v29 = vsel %vm422_vm7, %v1205_v11, %v1210_v9  ;;  %v518_v30 = vsel %vm422_vm7, %v1206_v10, %v1211_v5 }
  0x95   : > { %1233 = vrot.lane.b32.xlu0 %v1222_v37, %s1288_s18  ;;  %1238 = vrot.lane.b32.xlu1 %v1227_v38, %s1288_s18  ;;  %v531_v34 = vsel %vm492_vm8, %v1220_v15, %v1215_v17 }
  0x96   : > { %v598_v36 = vsel %vm425_vm9, %v517_v29, %v531_v34 }
  0x99   : > { %1243 = vrot.lane.b32.xlu0 %v1242_v45, %s1287_s17  ;;  %1248 = vrot.lane.b32.xlu1 %v1247_v46, %s1287_s17 }
  0x9d   : > { %1253 = vrot.lane.b32.xlu0 %v1242_v45, %s1288_s18  ;;  %1258 = vrot.lane.b32.xlu1 %v1247_v46, %s1288_s18  ;;  %v1525_v45 = vsel %vm492_vm8, %v1216_v16, %v1221_v12  ;;  %v1533_v46 = vsel %vm492_vm8, %v1215_v17, %v1220_v15 }
  0xa1   : > { %637 = vperm.xlu0 %1262, %v633_v52   ;;  %642 = vperm.xlu1 %1263, %v634_v53  }
 0x103   : > { %v1224_v59 = vpop.permute.xlu0 %1223  ;;  %v1229_v60 = vpop.permute.xlu1 %1228 }
 0x104   : > { %v1226_v61 = vunpack.i.h.bf16 %v1224_v59  ;;  %v1225_v62 = vunpack.i.l.bf16 %v1224_v59  ;;  %v1231_v63 = vunpack.i.h.bf16 %v1229_v60  ;;  %v1230_v3 = vunpack.i.l.bf16 %v1229_v60 }
 0x106   : > { %v1492_v13 = vsel %vm422_vm7, %v1225_v62, %v1230_v3  ;;  %v1496_v14 = vsel %vm422_vm7, %v1226_v61, %v1231_v63  ;;  %v482_v31 = vsel %vm422_vm7, %v1230_v3, %v1225_v62  ;;  %v483_v32 = vsel %vm422_vm7, %v1231_v63, %v1226_v61 }
 0x107   : > { %v1234_v18 = vpop.permute.xlu0 %1233  ;;  %v1239_v19 = vpop.permute.xlu1 %1238  ;;  %v506_v20 = vpack.c.bf16 %v1496_v14, %v1492_v13  ;;  %v538_v62 = vpack.c.bf16 %v518_v30, %v517_v29  ;;  %v533_v63 = vsel %vm422_vm7, %v1533_v46, %v519_v28  ;;  %v535_v3 = vsel %vm422_vm7, %v1525_v45, %v520_v27 }
 0x108   : > { %v1236_v21 = vunpack.i.h.bf16 %v1234_v18  ;;  %v1235_v22 = vunpack.i.l.bf16 %v1234_v18  ;;  %v1241_v25 = vunpack.i.h.bf16 %v1239_v19  ;;  %v1240_v26 = vunpack.i.l.bf16 %v1239_v19 }
 0x109   : > { %658 = vmatprep.subr.bf16.mxu0 %v506_v20 }
 0x10a   : > { %v493_v37 = vsel %vm492_vm8, %v1235_v22, %v1240_v26  ;;  %v494_v38 = vsel %vm492_vm8, %v1236_v21, %v1241_v25 }
 0x10b   : > { %v1244_v51 = vpop.permute.xlu0 %1243  ;;  %v1249_v52 = vpop.permute.xlu1 %1248  ;;  %v501_v53 = vsel %vm422_vm7, %v493_v37, %v482_v31  ;;  %v503_v54 = vsel %vm422_vm7, %v494_v38, %v483_v32  ;;  %v537_v32 = vpack.c.bf16 %v535_v3, %v533_v63  ;;  %v593_v43 = vpack.c.bf16 %v494_v38, %v493_v37 }
 0x10c   : > { %v1246_v55 = vunpack.i.h.bf16 %v1244_v51  ;;  %v1245_v56 = vunpack.i.l.bf16 %v1244_v51  ;;  %v1251_v59 = vunpack.i.h.bf16 %v1249_v52  ;;  %v1250_v60 = vunpack.i.l.bf16 %v1249_v52 }
 0x10d   : > { %v505_v61 = vpack.c.bf16 %v503_v54, %v501_v53 }
 0x10e   : > { %v549_v10 = vsel %vm422_vm7, %v1245_v56, %v1250_v60  ;;  %v550_v11 = vsel %vm422_vm7, %v1246_v55, %v1251_v59  ;;  %v552_v28 = vsel %vm422_vm7, %v1251_v59, %v1246_v55  ;;  %v551_v27 = vsel %vm422_vm7, %v1250_v60, %v1245_v56 }
 0x10f   : > { %659 = vmatpush1.bf16.msra.mxu0 %v505_v61  ;;  %v1254_v5 = vpop.permute.xlu0 %1253  ;;  %v1259_v9 = vpop.permute.xlu1 %1258  ;;  %v570_v53 = vpack.c.bf16 %v550_v11, %v549_v10  ;;  %v578_v56 = vpack.c.bf16 %v1364_v4, %v1360_v2  ;;  %v577_v59 = vpack.c.bf16 %v1358_v1, %v1356_v0  ;;  %v495_v60 = vsel %vm492_vm8, %v1240_v26, %v1235_v22 }
 0x110   : > { %v1256_v18 = vunpack.i.h.bf16 %v1254_v5  ;;  %v1255_v19 = vunpack.i.l.bf16 %v1254_v5  ;;  %v1261_v20 = vunpack.i.h.bf16 %v1259_v9  ;;  %v1260_v31 = vunpack.i.l.bf16 %v1259_v9  ;;  %660 = vmatprep.subr.bf16.mxu0 %v538_v62 }
 0x111   : > { %v496_v62 = vsel %vm492_vm8, %v1241_v25, %v1236_v21  ;;  %v590_v4 = vsel %vm425_vm9, %v1492_v13, %v495_v60  ;;  %v532_v1 = vsel %vm492_vm8, %v1221_v12, %v1216_v16  ;;  %v1264_v12 = vld [vmem:[%s1714_s1] ss:$8 sps:$4 sm:$0xff]  }
 0x112   : > { %v562_v51 = vsel %vm492_vm8, %v1256_v18, %v1261_v20  ;;  %v561_v52 = vsel %vm492_vm8, %v1255_v19, %v1260_v31  ;;  %v592_v33 = vsel %vm425_vm9, %v1496_v14, %v496_v62  ;;  %v563_v57 = vsel %vm492_vm8, %v1260_v31, %v1255_v19 }
 0x113   : > { %661 = vmatpush1.bf16.msra.mxu0 %v537_v32  ;;  %v565_v54 = vsel %vm422_vm7, %v561_v52, %v551_v27  ;;  %v567_v61 = vsel %vm422_vm7, %v562_v51, %v552_v28  ;;  %v594_v35 = vpack.c.bf16 %v592_v33, %v590_v4  ;;  %v606_v41 = vsel %vm425_vm9, %v549_v10, %v563_v57 }
 0x114   : > { %662 = vmatprep.subr.bf16.mxu0 %v570_v53  ;;  %v569_v55 = vpack.c.bf16 %v567_v61, %v565_v54  ;;  %v609_v58 = vpack.c.bf16 %v562_v51, %v561_v52  ;;  %v721_v51 = vld [vmem:[%s1716_s3] sm:$0x7]  ;;  %v1291_v33 = vmov 1966171168  }
 0x117   : > { %663 = vmatpush1.bf16.msra.mxu0 %v569_v55 }
 0x118   : > { %664 = vmatprep.subr.bf16.mxu0 %v574_v47  ;;  %v600_v47 = vsel %vm425_vm9, %v518_v30, %v532_v1  ;;  %v875_v1 = vunpack.c.l.s4 %v1291_v33 }
 0x119   : > { %v602_v44 = vpack.c.bf16 %v600_v47, %v598_v36 }
 0x11b   : > { %665 = vmatpush1.bf16.msra.mxu0 %v573_v48  ;;  %v564_v48 = vsel %vm492_vm8, %v1261_v20, %v1256_v18 }
 0x11c   : > { %666 = vmatprep.subr.bf16.mxu0 %v578_v56  ;;  %v608_v42 = vsel %vm425_vm9, %v550_v11, %v564_v48 }
 0x11f   : > { %667 = vmatpush1.bf16.msra.mxu0 %v577_v59 }
 0x120   : > { %668 = vmatprep.subr.bf16.mxu0 %v582_v49  ;;  %v601_v49 = vpack.c.bf16 %v1525_v45, %v1533_v46  ;;  %v638_v13 = vpop.permute.xlu0 %637  ;;  %v643_v15 = vpop.permute.xlu1 %642  ;;  %v1290_v46 = vmov 0.0  }
 0x121   : > { %790 = vmatprep.mubr.f32.mxu1 %v1290_v46 }
 0x123   : > { %669 = vmatpush1.bf16.msra.mxu0 %v581_v50  ;;  %v610_v50 = vpack.c.bf16 %v608_v42, %v606_v41 }
 0x124   : > { %670 = vmatprep.subr.bf16.mxu0 %v594_v35 }
 0x127   : > { %671 = vmatpush1.bf16.msra.mxu0 %v593_v43  ;;  %v860_v43 = vshrl.u32 %v391_v6, 7 }
 0x128   : > { %672 = vmatprep.subr.bf16.mxu0 %v602_v44  ;;  %v876_v44 = vunpack.c.0.s8 %v875_v1 }
 0x12b   : > { %673 = vmatpush1.bf16.msra.mxu0 %v601_v49 }
 0x12c   : > { %674 = vmatprep.subr.bf16.mxu0 %v610_v50 }
 0x12f   : > { %675 = vmatpush1.bf16.msra.mxu0 %v609_v58 }
 0x132   : > { %691 = vmatmul.mubr.bf16.vlgmr.msra.gmra.mrb[0].mxu0 %v1264_v12 }
 0x205   : > { %v692_v14 = vpop.f32.mrb[0].mxu0 }
 0x206   : > { %v693_v16 = vadd.f32 %v692_v14, %v638_v13  ;;  %v694_v17 = vpop.f32.mrb[1].mxu0 }
 0x207   : > { %v695_v21 = vadd.f32 %v694_v17, %v638_v13  ;;  %v696_v22 = vpop.f32.mrb[2].mxu0  ;;  %v879_v13 = vsub.s32 %v876_v44, %v860_v43 }
 0x208   : > { %913 = vst [vmem:[%s379_s11] sm:$0xff] %v693_v16  ;;  %v697_v25 = vadd.f32 %v696_v22, %v643_v15  ;;  %v698_v26 = vpop.f32.mrb[3].mxu0 }
 0x209   : > { %914 = vst [vmem:[%s379_s11 + $0x8] sm:$0xff] %v695_v21  ;;  %v699_v29 = vadd.f32 %v698_v26, %v643_v15 }
 0x20a   : > { %v701_v30 = vadd.f32 %v697_v25, %v693_v16  ;;  %915 = vst [vmem:[%s384_s14] sm:$0xff] %v697_v25 }
 0x20b   : > { %v702_v37 = vadd.f32 %v699_v29, %v695_v21  ;;  %916 = vst [vmem:[%s384_s14 + $0x8] sm:$0xff] %v699_v29 }
 0x20c   : > { %1267 = vtanh.f32 %v701_v30 }
 0x20d   : > { %1269 = vtanh.f32 %v702_v37 }
 0x216   : > { %v1268_v38 = vpop.eup %1267 }
 0x217   : > { %v1270_v45 = vpop.eup %1269  ;;  %917 = vst [vmem:[%s389_s21] sm:$0xff] %v1268_v38  ;;  %705 = vrot.lane.b32.xlu1 %v1268_v38, %s1286_s16 }
 0x218   : > { %918 = vst [vmem:[%s389_s21 + $0x8] sm:$0xff] %v1270_v45  ;;  %707 = vrot.lane.b32.xlu0 %v1270_v45, %s1286_s16 }
 0x21b   : > { %711 = vrot.lane.b32.xlu1 %v1268_v38, %s1285_s15 }
 0x21c   : > { %713 = vrot.lane.b32.xlu0 %v1270_v45, %s1285_s15 }
 0x289   : > { %v706_v63 = vpop.permute.xlu1 %705 }
 0x28a   : > { %v708_v3 = vpop.permute.xlu0 %707 }
 0x28b   : > { %v709_v10 = vsel %vm438_vm1, %v706_v63, %v708_v3  ;;  %v710_v11 = vsel %vm438_vm1, %v708_v3, %v706_v63 }
 0x28d   : > { %v712_v5 = vpop.permute.xlu1 %711 }
 0x28e   : > { %v714_v9 = vpop.permute.xlu0 %713 }
 0x28f   : > { %v715_v18 = vsel %vm451_vm0, %v712_v5, %v714_v9  ;;  %v716_v19 = vsel %vm451_vm0, %v714_v9, %v712_v5  ;;  %v861_v5 = vsub.s32 0, %v860_v43 }
 0x290   : > { %v718_v20 = vsel %vm1390_vm3, %v716_v19, %v709_v10  ;;  %v717_v31 = vsel %vm1386_vm2, %v715_v18, %v710_v11  ;;  %v720_v27 = vsel %vm1436_vm5, %v709_v10, %v716_v19  ;;  %v719_v24 = vsel %vm1430_vm4, %v710_v11, %v715_v18 }
 0x291   : > { %v1163_v28 = vpack.c.bf16 %v1270_v45, %v718_v20  ;;  %v1165_v32 = vpack.c.bf16 %v1268_v38, %v717_v31 }
 0x293   : > { %1164 = vmatprep.subr.bf16.mxu1 %v1163_v28 }
 0x294   : > { %1166 = vmatpush1.bf16.msra.mxu1 %v1165_v32 }
 0x295   : > { %730 = vmatprep.subr.mxu1 %v720_v27 }
 0x298   : > { %731 = vmatpush1.msra.mxu1 %v719_v24 }
 0x299   : > { %1155 = vmatmul.mubr.msk.f32.vlgmr.msra.gmra.mrb[0].mxu1 %vm722_vm10, %v721_v51 }
 0x36c   : > { %v792_v23 = vpop.f32.mrb[0].mxu1 }
 0x36d   : > { %797 = vrot.lane.b32.xlu1 %v792_v23, %s1287_s17  ;;  %v794_v52 = vpop.f32.mrb[1].mxu1  ;;  %v819_v40 = vrot.slane %v792_v23, 2  ;;  %v813_v62 = vrot.slane %v792_v23, 1 }
 0x36e   : > { %799 = vrot.lane.b32.xlu0 %v794_v52, %s1287_s17  ;;  %v820_v53 = vrot.slane %v794_v52, 2  ;;  %v814_v48 = vrot.slane %v794_v52, 1 }
 0x371   : > { %803 = vrot.lane.b32.xlu1 %v792_v23, %s1288_s18 }
 0x372   : > { %805 = vrot.lane.b32.xlu0 %v794_v52, %s1288_s18 }
 0x375   : > { %823 = vrot.lane.b32.xlu1 %v819_v40, %s1288_s18 }
 0x376   : > { %825 = vrot.lane.b32.xlu0 %v820_v53, %s1288_s18 }
 0x379   : > { %829 = vrot.lane.b32.xlu1 %v819_v40, %s1287_s17 }
 0x37a   : > { %831 = vrot.lane.b32.xlu0 %v820_v53, %s1287_s17  ;;  %s1144_s17 = sshll.u32 %s1734_s10, 1 }
 0x37b   : > { %s374_s23 = scalar_lea.vmem %s1719_s6, %s1144_s17  ;;  %s370_s11 = scalar_lea.vmem %s1718_s5, %s1144_s17 }
 0x3df   : > { %v798_v39 = vpop.permute.xlu1 %797 }
 0x3e0   : > { %v800_v54 = vpop.permute.xlu0 %799 }
 0x3e1   : > { %v802_v56 = vsel %vm422_vm7, %v800_v54, %v798_v39  ;;  %v801_v36 = vsel %vm422_vm7, %v798_v39, %v800_v54 }
 0x3e2   : > { %v818_v42 = vadd.f32 %v814_v48, %v801_v36 }
 0x3e3   : > { %v804_v61 = vpop.permute.xlu1 %803 }
 0x3e4   : > { %v806_v55 = vpop.permute.xlu0 %805 }
 0x3e5   : > { %v807_v59 = vsel %vm492_vm8, %v804_v61, %v806_v55 }
 0x3e6   : > { %v809_v60 = vsel %vm422_vm7, %v807_v59, %v802_v56 }
 0x3e7   : > { %v824_v4 = vpop.permute.xlu1 %823  ;;  %v817_v35 = vadd.f32 %v813_v62, %v809_v60 }
 0x3e8   : > { %v826_v34 = vpop.permute.xlu0 %825 }
 0x3e9   : > { %v827_v47 = vsel %vm492_vm8, %v824_v4, %v826_v34  ;;  %v828_v49 = vsel %vm492_vm8, %v826_v34, %v824_v4 }
 0x3ea   : > { %v837_v50 = vadd.f32 %v827_v47, %v817_v35 }
 0x3eb   : > { %v830_v57 = vpop.permute.xlu1 %829 }
 0x3ec   : > { %v832_v41 = vpop.permute.xlu0 %831  ;;  %v840_v16 = vsel %vm839_vm11, %v837_v50, -inf }
 0x3ed   : > { %v833_v58 = vsel %vm422_vm7, %v830_v57, %v832_v41 }
 0x3ee   : > { %v836_v12 = vsel %vm425_vm9, %v833_v58, %v828_v49 }
 0x3ef   : > { %v838_v14 = vadd.f32 %v836_v12, %v818_v42 }
 0x3f1   : > { %v896_v15 = vcombine.low %v837_v50, %v838_v14  ;;  %v841_v17 = vsel %vm839_vm11, %v838_v14, -inf }
 0x3f2   : > { %v842_v21 = vmax.f32 %v840_v16, %v841_v17 }
 0x3f3   : > { %v903_v22 = vrot.slane %v896_v15, %v879_v13 }
 0x3f4   : > { %843 = vmax.xlane.f32.xlu1 %v842_v21 }
 0x3f5   : > { %v910_v8 = vrot.slane %v903_v22, %v879_v13 }
 0x3f7   : > { %912 = vst.msk [vmem:[%s374_s23] sm:$0x3] %vm1689_vm12, %v910_v8 }
 0x481   : > { %v844_v25 = vpop.xlane.xlu1 %843 }
 0x482   : > { %v845_v26 = vsub.f32 %v837_v50, %v844_v25  ;;  %v846_v29 = vsub.f32 %v838_v14, %v844_v25 }
 0x484   : > { %v847_v30 = vmul.f32 1.442695, %v845_v26  ;;  %v849_v37 = vmul.f32 1.442695, %v846_v29 }
 0x486   : > { %1271 = vpow2.f32 %v847_v30 }
 0x487   : > { %1273 = vpow2.f32 %v849_v37 }
 0x490   : > { %v1272_v38 = vpop.eup %1271 }
 0x491   : > { %v1274_v45 = vpop.eup %1273  ;;  %v851_v6 = vsel %vm839_vm11, %v1272_v38, 0.0 }
 0x492   : > { %v852_v46 = vsel %vm839_vm11, %v1274_v45, 0.0 }
 0x493   : > { %v853_v63 = vadd.f32 %v852_v46, %v851_v6 }
 0x495   : > { %854 = vadd.xlane.f32.xlu0 %v853_v63 }
 0x522   : > { %v855_v3 = vpop.xlane.xlu0 %854 }
 0x523   : > { %1275 = vrcp.f32 %v855_v3 }
 0x52d   : > { %v1276_v9 = vpop.eup %1275 }
 0x52e   : > { %v857_v10 = vmul.f32 %v1276_v9, %v1272_v38  ;;  %v858_v11 = vmul.f32 %v1276_v9, %v1274_v45 }
 0x530   : > { %v862_v18 = vrot.slane %v857_v10, %v861_v5  ;;  %v866_v19 = vrot.slane %v858_v11, %v861_v5  ;;  %v873_v20 = vcombine.low %v857_v10, %v858_v11 }
 0x532   : > { %v867_v31 = vmul.f32 %v862_v18, %v1356_v0  ;;  %v868_v28 = vmul.f32 %v866_v19, %v1360_v2  ;;  %v880_v32 = vrot.slane %v873_v20, %v879_v13 }
 0x534   : > { %869 = vst [vmem:[%s366_s26] sm:$0xff] %v867_v31  ;;  %870 = vst [vmem:[%s366_s26 + $0x8] sm:$0xff] %v868_v28  ;;  %v887_v27 = vrot.slane %v880_v32, %v879_v13 }
 0x536   : > { %893 = vst.msk [vmem:[%s370_s11] sm:$0x3] %vm1689_vm12, %v887_v27 }
 0x537 PF: > { %s20_s30 = sadd.s32 1, %s1283_s30  }
 0x538   : > { %p17_p4 = scmp.ge.s32.totalorder %s20_s30, 4  }
 0x53a   :  { %19 = sbr.rel (!%p17_p4) target bundleno = 1 (0x1), region = 126 }

</bundles_post_ra>
